<compile_context>
chip_gen: v7x
topology: tpu7x:2x2x1
jax: 0.10.0
libtpu: 0.0.40
codegen_flags: <defaults>
</compile_context>

<pallas_src>
import functools

import jax
import jax.numpy as jnp
from jax.experimental import pallas as pl
from jax.experimental.pallas import tpu as pltpu


# --------------------------------------------------------------------------
# Wrapper tuning knobs (bytes)
# --------------------------------------------------------------------------
_GRIDLESS_MAX_BYTES = 6 << 20      # stay gridless below this total footprint
_TARGET_BLOCK_BYTES = 2 << 20      # ~2 MiB per input block when gridded
_PIPELINE_VMEM_BUDGET = 14 << 20   # 2 bufs x (2 in + 1 out) blocks + consts; v7x-safe
_VMEM = pltpu.MemorySpace.VMEM
_SMEM = pltpu.MemorySpace.SMEM


def _round_up(x, m):
    return -(-x // m) * m


# --------------------------------------------------------------------------
# Kernels
# --------------------------------------------------------------------------
def _avg_max_kernel(kin_ref, cv_ref, out_ref, *, mode):
    """Pure elementwise fusion (operates on lane-dense slabs when possible)."""
    kin = kin_ref[...]
    cv = cv_ref[...]
    if mode == "avg":
        out_ref[...] = (cv + kin) * 0.5
    else:  # "max": torch.max(torch.stack([kin, cv], 0), 0)[0] == elementwise max
        out_ref[...] = jnp.maximum(kin, cv)


def _rowwise_fusion_kernel(kin_ref, cv_ref, out_ref, *, mode):
    """dot-att / adain fusion: per-row (lane-axis) reductions."""
    kin = kin_ref[...]
    cv = cv_ref[...]
    if mode == "dot-att":
        alpha = jnp.sum(cv * kin, axis=1, keepdims=True)          # (B, 1)
        out_ref[...] = cv * alpha + kin * (1.0 - alpha)
    else:
        # ada_in(style, content):
        #   style_std*(content-content_mean)/content_std + style_mean
        # torch.std uses the unbiased estimator (ddof=1).
        style, content = (kin, cv) if mode == "adain-kin-cv" else (cv, kin)
        n = style.shape[1]
        inv_n = 1.0 / n
        inv_nm1 = 1.0 / (n - 1)                    # wrapper guards n >= 2
        # Two-pass (centered) variance: no E[x^2]-mean^2 cancellation; the
        # extra lane reductions are free in this HBM-bound kernel, and the
        # centered sum of squares is non-negative by construction.
        s_mean = jnp.sum(style, axis=1, keepdims=True) * inv_n
        c_mean = jnp.sum(content, axis=1, keepdims=True) * inv_n
        s_cent = style - s_mean
        c_cent = content - c_mean
        s_var = jnp.sum(s_cent * s_cent, axis=1, keepdims=True) * inv_nm1
        c_var = jnp.sum(c_cent * c_cent, axis=1, keepdims=True) * inv_nm1
        # Divide-free: s_std / c_std == sqrt(s_var) * rsqrt(c_var); rsqrt runs
        # on the EUP slot, which is otherwise idle here.  Constant rows
        # (c_var == 0) give inf/nan, matching the reference's divide-by-zero.
        scale = jnp.sqrt(s_var) * jax.lax.rsqrt(c_var)
        out_ref[...] = scale * c_cent + s_mean


def _make_concat_kernel(d):
    """torch.cat([cv, kin], axis=1) as two direct slice stores (no concat value)."""

    def kernel(kin_ref, cv_ref, out_ref):
        # For D % 128 == 0 both stores are full-vreg unmasked vst with no
        # cross-lane relayout; the (TB, 2D) value is never materialised.
        out_ref[:, :d] = cv_ref[...]
        out_ref[:, d:] = kin_ref[...]

    return kernel


def _make_mlp_att_kernel(n_hidden):
    """concat-free MLP attention: split-W0 matmuls -> ReLU MLP -> VPU last layer."""

    def kernel(*refs):
        kin_ref, cv_ref = refs[0], refs[1]
        out_ref = refs[-1]
        params = refs[2:-1]
        b_last = params[-1][0, 0]            # (1,1) SMEM scalar (no retrace per ckpt)
        cv = cv_ref[...]
        kin = kin_ref[...]
        if n_hidden == 0:
            # Single Linear(2D -> 1): pure VPU multiply + lane reduce.
            w_cvT, w_kinT = params[0], params[1]
            logit = (jnp.sum(cv * w_cvT[...], axis=1, keepdims=True)
                     + jnp.sum(kin * w_kinT[...], axis=1, keepdims=True)
                     + b_last)
        else:
            # First layer: W0 split into cv/kin halves -> two MXU pushes,
            # no (B, 2D) concat intermediate.
            w0_cv, w0_kin, b0 = params[0], params[1], params[2]
            x = (jnp.dot(cv, w0_cv[...], preferred_element_type=jnp.float32)
                 + jnp.dot(kin, w0_kin[...], preferred_element_type=jnp.float32)
                 + b0[...])
            x = jnp.maximum(x, 0.0)                               # ReLU
            idx = 3
            for _ in range(n_hidden - 1):
                w, b = params[idx], params[idx + 1]
                idx += 2
                x = jnp.maximum(
                    jnp.dot(x, w[...], preferred_element_type=jnp.float32)
                    + b[...], 0.0)
            # Final layer has out_dim=1: an MXU matmul with N=1 wastes a push;
            # do it as a VPU multiply + lane reduction instead.
            w_lastT = params[idx][...]                            # (1, H_last)
            logit = jnp.sum(x * w_lastT, axis=1, keepdims=True) + b_last
        alpha = jax.nn.sigmoid(logit)                             # (B, 1)
        out_ref[...] = cv * alpha + kin * (1.0 - alpha)

    return kernel


# --------------------------------------------------------------------------
# pallas_call wrapper: footprint-gated gridless vs. batch-tiled pipeline
# --------------------------------------------------------------------------
def _pick_batch_tile(batch, d_in, out_cols, const_bytes):
    """Rows per batch tile: ~1-2 MiB per input block, v7x-safe residency."""
    row_bytes = 4 * (2 * d_in + out_cols)
    tb = min(max(_TARGET_BLOCK_BYTES // (4 * d_in), 8),
             max((_PIPELINE_VMEM_BUDGET - const_bytes) // (2 * row_bytes), 8))
    # Always >=2 grid steps (pipelining + both v7x TensorCores); prefer >=4
    # steps while each input block still holds >= ~1 MiB.
    tb = min(tb, _round_up(-(-batch // 2), 8))
    quarter = _round_up(-(-batch // 4), 8)
    if quarter * 4 * d_in >= (1 << 20):
        tb = min(tb, quarter)
    tb = max((tb // 8) * 8, 8)
    return min(tb, batch)


def _fusion_call(kernel, out_cols, kin, cv, consts=(), const_spaces=()):
    batch, d_in = cv.shape
    consts = tuple(consts)
    const_spaces = tuple(const_spaces) if const_spaces else (_VMEM,) * len(consts)
    const_bytes = sum(int(c.size) * 4 for c in consts)
    out_shape = jax.ShapeDtypeStruct((batch, out_cols), jnp.float32)

    total_bytes = 4 * batch * (2 * d_in + out_cols) + const_bytes
    if total_bytes <= _GRIDLESS_MAX_BYTES:
        # Gridless: the whole (small) problem lives in VMEM.  At these sizes
        # the ~0.35 us/step grid overhead would dominate the HBM time.
        io_spec = pl.BlockSpec(memory_space=_VMEM)
        const_specs = [pl.BlockSpec(memory_space=s) for s in const_spaces]
        return pl.pallas_call(
            kernel,
            out_shape=out_shape,
            in_specs=[io_spec, io_spec, *const_specs],
            out_specs=io_spec,
        )(kin, cv, *consts)

    # Batch-tiled pipeline: ~1-2 MiB blocks, remainder-capable grid, batch axis
    # marked "parallel" so v7x's two TensorCores (megacore) can shard it.
    tb = _pick_batch_tile(batch, d_in, out_cols, const_bytes)
    row_bytes = 4 * (2 * d_in + out_cols)
    pipeline_bytes = 2 * tb * row_bytes + const_bytes      # double-buffered residency
    vmem_limit = min(32 << 20, max(16 << 20, pipeline_bytes + (4 << 20)))

    def io_spec(cols):
        return pl.BlockSpec((tb, cols), lambda i: (i, 0), memory_space=_VMEM)

    const_specs = []
    for c, space in zip(consts, const_spaces):
        if space is _SMEM:
            const_specs.append(pl.BlockSpec(memory_space=_SMEM))
        else:
            # Constant index_map: block fetched once and stays resident.
            # TODO(synk): pipeline_mode=pl.Buffered(1) would also drop the
            #             unused second revolving buffer (few KiB here).
            const_specs.append(
                pl.BlockSpec(c.shape, lambda i, _nd=c.ndim: (0,) * _nd,
                             memory_space=_VMEM))

    return pl.pallas_call(
        kernel,
        out_shape=out_shape,
        grid=(pl.cdiv(batch, tb),),          # partial last tile handles remainders
        in_specs=[io_spec(d_in), io_spec(d_in), *const_specs],
        out_specs=io_spec(out_cols),
        compiler_params=pltpu.CompilerParams(
            dimension_semantics=("parallel",),
            vmem_limit_bytes=int(vmem_limit)),
    )(kin, cv, *consts)


# --------------------------------------------------------------------------
# Module wrapper
# --------------------------------------------------------------------------
class FusionNetPallas:
    """JAX/Pallas re-implementation of FusionNet.forward.

    sigmoid_net (Single_Single) is assumed to be the standard
    Linear->ReLU->...->Linear(out_dim)->Sigmoid MLP implied by its name and
    constructor args (inp_dim=2*decoder_output, hidden_dims=fusion_dims,
    out_dim=1).
    """

    def __init__(self, fusion, fusion_dims, decoder_output, key):
        self.fusion = fusion
        self.decoder_output = decoder_output
        # Deterministic synthetic init for the sigmoid_net MLP (torch-like
        # uniform(-1/sqrt(fan_in), 1/sqrt(fan_in))).
        dims = [2 * decoder_output] + list(fusion_dims) + [1]
        self.weights = []
        self.biases = []
        for i in range(len(dims) - 1):
            key, kw, kb = jax.random.split(key, 3)
            bound = 1.0 / jnp.sqrt(dims[i])
            w = jax.random.uniform(kw, (dims[i], dims[i + 1]), jnp.float32,
                                   -bound, bound)
            b = jax.random.uniform(kb, (1, dims[i + 1]), jnp.float32,
                                   -bound, bound)
            self.weights.append(w)
            self.biases.append(b)

        # Pre-split mlp-att parameters (concat-free layout).  The scalar final
        # bias is a (1,1) SMEM operand so new checkpoints never retrace.
        self._n_hidden = len(fusion_dims)
        d = decoder_output
        if self._n_hidden == 0:
            w = self.weights[0]                                   # (2D, 1)
            consts = [w[:d].T, w[d:].T]                           # (1, D) each
        else:
            w0 = self.weights[0]                                  # (2D, H0)
            consts = [w0[:d], w0[d:], self.biases[0]]
            for w, b in zip(self.weights[1:-1], self.biases[1:-1]):
                consts += [w, b]
            consts.append(self.weights[-1].T)                     # (1, H_last)
        consts.append(self.biases[-1].reshape(1, 1))              # b_last -> SMEM
        self._mlp_consts = tuple(consts)
        self._mlp_spaces = (_VMEM,) * (len(consts) - 1) + (_SMEM,)

    def __call__(self, kin, cv):
        b, d = cv.shape
        mode = self.fusion

        if mode in ("avg", "max"):
            kern = functools.partial(_avg_max_kernel, mode=mode)
            total = b * d
            if d % 128 != 0 and total % 128 == 0:
                # Lane-dense slab: unmasked vld/vst instead of D<128 masked ops.
                rows = total // 128
                out = _fusion_call(kern, 128,
                                   kin.reshape(rows, 128),
                                   cv.reshape(rows, 128))
                return out.reshape(b, d)
            return _fusion_call(kern, d, kin, cv)

        if mode in ("dot-att", "adain-kin-cv", "adain-cv-kin"):
            if mode != "dot-att" and d < 2:
                raise ValueError(
                    "ada_in needs decoder_output >= 2 (unbiased std is "
                    "undefined at D=1; PyTorch returns NaN there).")
            kern = functools.partial(_rowwise_fusion_kernel, mode=mode)
            return _fusion_call(kern, d, kin, cv)

        if mode == "concat":
            if d % 128 != 0:
                # Pure data movement with sub-128-lane halves: both Pallas
                # stores would be masked partials and the custom-call boundary
                # dominates — let XLA do it (per perf review).
                return jnp.concatenate([cv, kin], axis=1)
            return _fusion_call(_make_concat_kernel(d), 2 * d, kin, cv)

        if mode == "mlp-att":
            kern = _make_mlp_att_kernel(self._n_hidden)
            return _fusion_call(kern, d, kin, cv,
                                consts=self._mlp_consts,
                                const_spaces=self._mlp_spaces)

        # TODO(synk): 'concat-ln' / 'concat-bn' raise in the PyTorch reference
        # (norm dim mismatch); intentionally not implemented.
        raise NotImplementedError(f"fusion mode {mode!r} not supported")


# --------------------------------------------------------------------------
# Pure-JAX references (for sanity checking the kernels)
# --------------------------------------------------------------------------
def _ref_forward(net, kin, cv):
    if net.fusion == "avg":
        return (cv + kin) / 2
    if net.fusion == "max":
        return jnp.maximum(kin, cv)
    if net.fusion == "concat":
        return jnp.concatenate([cv, kin], axis=1)
    if net.fusion in ("adain-kin-cv", "adain-cv-kin"):
        style, content = (kin, cv) if net.fusion == "adain-kin-cv" else (cv, kin)
        s_std = jnp.std(style, axis=1, ddof=1, keepdims=True)
        c_std = jnp.std(content, axis=1, ddof=1, keepdims=True)
        s_mean = jnp.mean(style, axis=1, keepdims=True)
        c_mean = jnp.mean(content, axis=1, keepdims=True)
        return s_std * (content - c_mean) / c_std + s_mean
    if net.fusion == "dot-att":
        alpha = jnp.sum(cv * kin, axis=1, keepdims=True)
        return cv * alpha + kin * (1 - alpha)
    if net.fusion == "mlp-att":
        x = jnp.concatenate([cv, kin], axis=1)
        for i, (w, bias) in enumerate(zip(net.weights, net.biases)):
            x = jnp.dot(x, w, precision=jax.lax.Precision.HIGHEST) + bias
            if i < len(net.weights) - 1:
                x = jnp.maximum(x, 0.0)
        alpha = jax.nn.sigmoid(x)
        return cv * alpha + kin * (1 - alpha)
    raise NotImplementedError


# --------------------------------------------------------------------------
if __name__ == "__main__":
    FUSION_DIMS = [32, 16]
    MODES = ["avg", "max", "concat", "adain-kin-cv", "adain-cv-kin",
             "dot-att", "mlp-att"]
    # dot-att / mlp-att tolerances cover f32 reduction-order and MXU
    # default-precision differences vs the Precision.HIGHEST reference only;
    # the math is identical.
    TOLS_SMALL = {
        "avg": (1e-6, 1e-6), "max": (1e-6, 1e-6), "concat": (1e-6, 1e-6),
        "dot-att": (1e-3, 1e-4),
        "adain-kin-cv": (1e-4, 1e-4), "adain-cv-kin": (1e-4, 1e-4),
        "mlp-att": (1e-4, 1e-4),
    }
    TOLS_LARGE = dict(TOLS_SMALL)
    TOLS_LARGE.update({"adain-kin-cv": (5e-4, 1e-4),
                       "adain-cv-kin": (5e-4, 1e-4),
                       "mlp-att": (2e-3, 1e-3)})

    key = jax.random.PRNGKey(0)
    k_kin, k_cv, k_params = jax.random.split(key, 3)

    def check(modes, b, d, tols):
        kin = jax.random.normal(jax.random.fold_in(k_kin, b * d), (b, d),
                                jnp.float32)
        cv = jax.random.normal(jax.random.fold_in(k_cv, b * d), (b, d),
                               jnp.float32)
        for mode in modes:
            net = FusionNetPallas(mode, FUSION_DIMS, d, k_params)
            out = jax.block_until_ready(net(kin, cv))
            ref = _ref_forward(net, kin, cv)
            atol, rtol = tols[mode]
            assert out.shape == ref.shape, (mode, b, d, out.shape, ref.shape)
            assert jnp.allclose(out, ref, atol=atol, rtol=rtol), (mode, b, d)

    # Small production-like shape: gridless; avg/max take the lane-dense
    # reshape path.
    check(MODES, 8, 32, TOLS_SMALL)

    # Mid shape: ~1.5 MiB footprint -> stays gridless under the byte gate
    # (previously this shape was gridded and paid pure pipeline overhead).
    check(["max", "dot-att", "adain-cv-kin", "concat", "mlp-att"],
          1024, 128, TOLS_SMALL)

    # Large shape with a non-divisible batch: footprint > 6 MiB -> batch-tiled
    # "parallel" grid with ~1 MiB blocks, >=4 steps, a partial last tile, and
    # an explicit vmem_limit_bytes.
    check(["max", "dot-att", "adain-cv-kin", "concat", "mlp-att"],
          4136, 256, TOLS_LARGE)

    print("KERNEL_OK")
</pallas_src>

<mosaic_0001>
module attributes {stable_mosaic.version = 11 : i64} {
  func.func @_avg_max_kernel(%arg0: memref<2x128xf32, #tpu.memory_space<vmem>>, %arg1: memref<2x128xf32, #tpu.memory_space<vmem>>, %arg2: memref<2x128xf32, #tpu.memory_space<vmem>>) attributes {dimension_semantics = [], scalar_prefetch = 0 : i64, scratch_operands = 0 : i64, tpu.core_type = #tpu.core_type<tc>} {
    %c0 = arith.constant 0 : index
    %c0_0 = arith.constant 0 : index
    %0 = vector.load %arg0[%c0, %c0_0] : memref<2x128xf32, #tpu.memory_space<vmem>>, vector<2x128xf32>
    %c0_1 = arith.constant 0 : index
    %c0_2 = arith.constant 0 : index
    %1 = vector.load %arg1[%c0_1, %c0_2] : memref<2x128xf32, #tpu.memory_space<vmem>>, vector<2x128xf32>
    %2 = arith.addf %1, %0 : vector<2x128xf32>
    %cst = arith.constant 5.000000e-01 : f32
    %3 = vector.broadcast %cst : f32 to vector<2x128xf32>
    %4 = arith.mulf %2, %3 : vector<2x128xf32>
    %c0_3 = arith.constant 0 : index
    %c0_4 = arith.constant 0 : index
    %5 = vector.load %arg2[%c0_3, %c0_4] : memref<2x128xf32, #tpu.memory_space<vmem>>, vector<2x128xf32>
    tpu.vector_store %arg2[%c0_3, %c0_4], %4 {strides = array<i32>} : memref<2x128xf32, #tpu.memory_space<vmem>>, vector<2x128xf32>,
    return
  }
}

</mosaic_0001>

<bundles_post_ra>
// kernel: tpu_custom_call.1
= control target key start
LH: loop header
LB: loop body
LE: loop exit
PB: predicated region body
PF: predicated region fallthrough
CT: control target
= control target key end

     0   :  { %7 = vsyncpa [#allocation3], 0  ;;  %s138_s0 = inlined_call_operand.hbm [shape: f32[2,128], index: 0, kind: input, shape index: {}]   ;;  %s139_s1 = inlined_call_operand.vmem [shape: f32[2,128], index: 1, kind: input, shape index: {}]   ;;  %s140_s2 = inlined_call_operand.hbm [shape: f32[2,128], index: 2, kind: output, shape index: {}]  }
   0x1   :  { %8 = vsyncpa [#allocation4], 0  ;;  %s94_s9 = smov [#allocation2]   ;;  %s46_s13 = scalar_lea.hbm %s138_s0, 32 }
   0x2   :  { %s15_s10 = sshll.u32 %s94_s9, 4  ;;  %p47_p0 = scmp.ne.s32.totalorder %s138_s0, %s46_s13  ;;  %s16_s10 = int_to_ptr.vmem [resolvable:$true] %s15_s10 }
   0x3   :  { %p50_p1 = scmp.lt.u32.totalorder %s46_s13, %s138_s0 }
   0x5   :  { %p52_p2 = pnand %p50_p1, %p47_p0 }
   0x7   :  { %55 = shalt.err (!%p52_p2)
}
   0x8   :  { %s56_s18 = scalar_lea.vmem %s16_s10, 32  ;;  %p61_p4 = scmp.lt.s32.totalorder %s16_s10, %s16_s10 }
   0x9   :  { %p57_p3 = scmp.ne.s32.totalorder %s16_s10, %s56_s18  ;;  %p62_p5 = scmp.lt.s32.totalorder %s56_s18, %s56_s18 }
   0xb   :  { %p63_p6 = por %p62_p5, %p61_p4 }
   0xd   :  { %p64_p7 = pnand %p63_p6, %p57_p3 }
   0xf   :  { %67 = shalt.err (!%p64_p7)
}
  0x10   :  { %18 = dma.hbm_to_vmem [thread:$0]  %s138_s0, 32, %s16_s10, [#allocation3]  }
  0x11   :  { %90 = dma.done.wait [#allocation3], 32  }
  0x12   :  { %91 = vsyncadd [#allocation3], 4294967264  ;;  %v24_v0 = vld [vmem:[#allocation2] sm:$0x3]  ;;  %s95_s23 = smov [#allocation5]  }
  0x13   :  { %v25_v1 = vld [vmem:[%s139_s1] sm:$0x3]  ;;  %s35_s24 = sshll.u32 %s95_s23, 4  ;;  %s36_s24 = int_to_ptr.vmem [resolvable:$true] %s35_s24 }
  0x14   :  { %v26_v2 = vadd.f32 %v25_v1, %v24_v0  ;;  %s68_s25 = scalar_lea.vmem %s36_s24, 32  ;;  %p73_p9 = scmp.lt.s32.totalorder %s36_s24, %s36_s24 }
  0x15   :  { %p69_p8 = scmp.ne.s32.totalorder %s36_s24, %s68_s25  ;;  %p74_p10 = scmp.lt.s32.totalorder %s68_s25, %s68_s25 }
  0x16   :  { %v27_v3 = vmul.f32 0.5, %v26_v2 }
  0x17   :  { %p75_p11 = por %p74_p10, %p73_p9 }
  0x18   :  { %28 = vst [vmem:[#allocation5] sm:$0x3] %v27_v3 }
  0x19   :  { %p76_p12 = pnand %p75_p11, %p69_p8 }
  0x1b   :  { %79 = shalt.err (!%p76_p12)
}
  0x1c   :  { %s80_s27 = scalar_lea.hbm %s140_s2, 32 }
  0x1d   :  { %p81_p13 = scmp.ne.s32.totalorder %s140_s2, %s80_s27  ;;  %p84_p0 = scmp.lt.u32.totalorder %s80_s27, %s140_s2 }
  0x1f   :  { %p86_p1 = pnand %p84_p0, %p81_p13 }
  0x21   :  { %89 = shalt.err (!%p86_p1)
}
  0x22   :  { %38 = dma.vmem_to_hbm [thread:$0]  %s36_s24, 32, %s140_s2, [#allocation4]  }
  0x23   :  { %92 = dma.done.wait [#allocation4], 32  }
  0x24   :  { %93 = vsyncadd [#allocation4], 4294967264 }
  0x25   :  { %42 = vsyncpa [#allocation3], 1 }
  0x26   :  { %43 = vsyncpa [#allocation4], 1 }

</bundles_post_ra>
